<compile_context>
chip_gen: v7x
topology: tpu7x:2x2x1
jax: 0.10.0
libtpu: 0.0.40
codegen_flags: <defaults>
</compile_context>

<pallas_src>
import math

import jax
import jax.numpy as jnp
from jax.experimental import pallas as pl
from jax.experimental.pallas import tpu as pltpu

_LANES = 128
_TARGET_TILE_BYTES = 2 * 1024 * 1024   # per grid step, both inputs, one buffer


def _round_down(x, m):
    return (x // m) * m


def _row_granule(dtype):
    # Minimum second-minor (sublane) multiple for this dtype's native tiling:
    # f32 -> 8, bf16 -> 16, int8/fp8 -> 32.
    return max(8, 32 // jnp.dtype(dtype).itemsize)


def _default_num_splits():
    # Two TensorCores per chip only on v7x-class parts; a size-2 "parallel"
    # split axis is pure overhead on single-TC chips (v5e / v6e).
    try:
        kind = jax.devices()[0].device_kind.lower()
    except Exception:
        return 1
    return 2 if ("v7" in kind or "7x" in kind) else 1


def _sums_jnp(lbl, prd):
    lbl = lbl.astype(jnp.float32)
    prd = prd.astype(jnp.float32)
    return jnp.sum(lbl), jnp.sum(prd * lbl)


def _finish(label_sum, inter_sum):
    smooth = jnp.float32(1e-6)
    iou = (inter_sum + smooth) / (label_sum + smooth)
    return -jnp.log(iou)


def _stenosis_loss_kernel(label_ref, pred_ref, out_ref, acc_lbl_ref, acc_int_ref):
    i = pl.program_id(1)

    @pl.when(i == 0)
    def _init():
        acc_lbl_ref[...] = jnp.zeros_like(acc_lbl_ref)
        acc_int_ref[...] = jnp.zeros_like(acc_int_ref)

    lbl = label_ref[...].astype(jnp.float32)
    prd = pred_ref[...].astype(jnp.float32)

    # Fold the (tile_rows, 128) tile onto the (8, 128) accumulators.  The
    # reshape groups whole (8,128) vreg tiles (free relabeling) and the
    # leading-axis sum lowers to plain VALU vreg adds — VMEM ld/st traffic per
    # vreg-pair drops from 4 vld + 2 vst to ~2 vld, keeping the kernel
    # HBM-bound instead of load/store-slot-bound.
    acc_lbl_ref[...] += lbl.reshape(-1, 8, _LANES).sum(axis=0)
    acc_int_ref[...] += (prd * lbl).reshape(-1, 8, _LANES).sum(axis=0)

    @pl.when(i == pl.num_programs(1) - 1)
    def _finalize():
        label_sum = jnp.sum(acc_lbl_ref[...])
        inter_sum = jnp.sum(acc_int_ref[...])
        # Pack the two partial sums into a deterministic (8, 128) output slab:
        # sublane 0 -> label_sum, sublanes 1..7 -> inter_sum.
        sub = jax.lax.broadcasted_iota(jnp.int32, (8, _LANES), 0)
        out_ref[0] = jnp.where(sub == 0, label_sum, inter_sum)


def stenosis_loss(label_line, predict, *, min_pallas_elements=1 << 20,
                  splits=None, max_tile_rows=None):
    """JAX/Pallas equivalent of the PyTorch stenosis_loss.forward."""
    label_line = jnp.asarray(label_line)
    predict = jnp.asarray(predict)
    assert label_line.shape == predict.shape

    n = math.prod(label_line.shape)

    def _flatten(x):
        # Keep floating dtypes native (kernel casts to f32 on-chip).  Widen
        # bool / integer masks only to bf16 (exact for 0/1 masks): half the
        # HBM bytes of f32 widening.
        if not jnp.issubdtype(x.dtype, jnp.floating):
            x = x.astype(jnp.bfloat16)
        return jnp.ravel(x)

    lbl = _flatten(label_line)
    prd = _flatten(predict)

    # Small inputs: kernel launch + pipeline prime dominate; fused XLA wins.
    if n < max(int(min_pallas_elements), 1):
        label_sum, inter_sum = _sums_jnp(lbl, prd)
        return _finish(label_sum, inter_sum)

    rows = pl.cdiv(n, _LANES)
    if rows * _LANES != n:
        # TODO(synk): mask the sub-128 ragged tail in-kernel to avoid this
        # (rare) full-array pad copy when numel is not a multiple of 128.
        lbl = jnp.pad(lbl, (0, rows * _LANES - n))
        prd = jnp.pad(prd, (0, rows * _LANES - n))

    lbl2 = lbl.reshape(rows, _LANES)
    prd2 = prd.reshape(rows, _LANES)

    granule = max(_row_granule(lbl2.dtype), _row_granule(prd2.dtype))
    bytes_per_row = (lbl2.dtype.itemsize + prd2.dtype.itemsize) * _LANES
    if max_tile_rows is None:
        target_rows = _TARGET_TILE_BYTES // bytes_per_row   # 2048 f32, 4096 bf16
    else:
        target_rows = int(max_tile_rows)
    target_rows = max(granule, _round_down(target_rows, granule))
    tile_rows = min(target_rows, _round_down(rows, granule))

    if tile_rows == 0:
        # Fewer rows than the dtype's minimum tile: nothing for the kernel.
        label_sum, inter_sum = _sums_jnp(lbl2, prd2)
        return _finish(label_sum, inter_sum)

    total_blocks = rows // tile_rows
    num_splits = _default_num_splits() if splits is None else int(splits)
    num_splits = max(1, min(num_splits, total_blocks))
    bps = total_blocks // num_splits          # grid steps per split
    main_rows = num_splits * bps * tile_rows  # rows streamed by the kernel

    in_index_map = lambda c, i: (c * bps + i, 0)

    kernel_bytes = main_rows * bytes_per_row + num_splits * 8 * _LANES * 4
    partials = pl.pallas_call(
        _stenosis_loss_kernel,
        out_shape=jax.ShapeDtypeStruct((num_splits, 8, _LANES), jnp.float32),
        grid_spec=pltpu.PrefetchScalarGridSpec(
            num_scalar_prefetch=0,
            grid=(num_splits, bps),
            in_specs=[
                pl.BlockSpec((tile_rows, _LANES), in_index_map),
                pl.BlockSpec((tile_rows, _LANES), in_index_map),
            ],
            out_specs=pl.BlockSpec((1, 8, _LANES), lambda c, i: (c, 0, 0)),
            scratch_shapes=[
                pltpu.VMEM((8, _LANES), jnp.float32),
                pltpu.VMEM((8, _LANES), jnp.float32),
            ],
        ),
        compiler_params=pltpu.CompilerParams(
            dimension_semantics=("parallel", "arbitrary"),
            vmem_limit_bytes=32 * 1024 * 1024,
        ),
        cost_estimate=pl.CostEstimate(
            flops=3 * main_rows * _LANES,
            transcendentals=0,
            bytes_accessed=kernel_bytes,
        ),
    )(lbl2, prd2)

    # Tiny cross-split combine (a few scalars) in the wrapper.
    label_sum = jnp.sum(partials[:, 0, 0])
    inter_sum = jnp.sum(partials[:, 1, 0])

    if main_rows < rows:
        # Ragged remainder (< num_splits * tile_rows rows): summed by fused
        # XLA instead of padding / copying the big inputs.
        t_lbl, t_int = _sums_jnp(lbl2[main_rows:], prd2[main_rows:])
        label_sum = label_sum + t_lbl
        inter_sum = inter_sum + t_int

    return _finish(label_sum, inter_sum)


def _reference(label_line, predict):
    smooth = 1e-6
    label_sum = jnp.sum(label_line)
    inter_sum = jnp.sum(predict * label_line)
    iou = (inter_sum + smooth) / (label_sum + smooth)
    return -jnp.log(iou)


if __name__ == "__main__":
    key = jax.random.PRNGKey(0)
    k1, k2, k3, k4 = jax.random.split(key, 4)

    # --- Case 1: NCHW float mask, single-block Pallas path ------------------
    shape1 = (2, 4, 16, 16)
    predict1 = jax.nn.sigmoid(jax.random.normal(k1, shape1, dtype=jnp.float32))
    label1 = (jax.random.uniform(k2, shape1) > 0.5).astype(jnp.float32)

    loss1 = stenosis_loss(label1, predict1, min_pallas_elements=0)
    jax.block_until_ready(loss1)
    ref1 = _reference(label1, predict1)
    assert jnp.allclose(loss1, ref1, rtol=1e-5, atol=1e-6), (loss1, ref1)

    # --- Case 2: bool mask (bf16 widening), forced 2-way split, multi-block
    #             grid plus ragged jnp-handled tail --------------------------
    shape2 = (2, 4, 24, 24)
    predict2 = jax.nn.sigmoid(jax.random.normal(k3, shape2, dtype=jnp.float32))
    label2_bool = jax.random.uniform(k4, shape2) > 0.5

    loss2 = stenosis_loss(label2_bool, predict2, min_pallas_elements=0,
                          splits=2, max_tile_rows=16)
    jax.block_until_ready(loss2)
    ref2 = _reference(label2_bool.astype(jnp.float32), predict2)
    assert jnp.allclose(loss2, ref2, rtol=1e-5, atol=1e-6), (loss2, ref2)

    # --- Case 3: default small-n short-circuit (no pallas) ------------------
    loss3 = stenosis_loss(label1, predict1)
    jax.block_until_ready(loss3)
    assert jnp.allclose(loss3, ref1, rtol=1e-5, atol=1e-6), (loss3, ref1)

    print("KERNEL_OK")
</pallas_src>

<mosaic_0001>
module attributes {stable_mosaic.version = 11 : i64} {
  func.func @_stenosis_loss_kernel(%arg0: i32, %arg1: i32, %arg2: memref<16x128xf32, #tpu.memory_space<vmem>>, %arg3: memref<16x128xf32, #tpu.memory_space<vmem>>, %arg4: memref<1x8x128xf32, #tpu.memory_space<vmem>>, %arg5: memref<8x128xf32, #tpu.memory_space<vmem>>, %arg6: memref<8x128xf32, #tpu.memory_space<vmem>>) attributes {dimension_semantics = [#tpu.dimension_semantics<parallel>, #tpu.dimension_semantics<arbitrary>], iteration_bounds = array<i64: 1, 1>, scalar_prefetch = 0 : i64, scratch_operands = 2 : i64, tpu.core_type = #tpu.core_type<tc>, window_params = [{transform_indices = @transform_0, window_bounds = array<i64: 16, 128>}, {transform_indices = @transform_1, window_bounds = array<i64: 16, 128>}, {transform_indices = @transform_2, window_bounds = array<i64: 1, 8, 128>}]} {
    %c0_i32 = arith.constant 0 : i32
    %0 = arith.cmpi eq, %arg1, %c0_i32 : i32
    %1 = arith.extui %0 : i1 to i32
    %c0_i32_0 = arith.constant 0 : i32
    %2 = arith.cmpi ne, %1, %c0_i32_0 : i32
    scf.if %2 {
      %cst_15 = arith.constant 0.000000e+00 : f32
      %19 = vector.broadcast %cst_15 : f32 to vector<8x128xf32>
      %c0_16 = arith.constant 0 : index
      %c0_17 = arith.constant 0 : index
      %20 = vector.load %arg5[%c0_16, %c0_17] : memref<8x128xf32, #tpu.memory_space<vmem>>, vector<8x128xf32>
      tpu.vector_store %arg5[%c0_16, %c0_17], %19 {strides = array<i32>} : memref<8x128xf32, #tpu.memory_space<vmem>>, vector<8x128xf32>,
      %cst_18 = arith.constant 0.000000e+00 : f32
      %21 = vector.broadcast %cst_18 : f32 to vector<8x128xf32>
      %c0_19 = arith.constant 0 : index
      %c0_20 = arith.constant 0 : index
      %22 = vector.load %arg6[%c0_19, %c0_20] : memref<8x128xf32, #tpu.memory_space<vmem>>, vector<8x128xf32>
      tpu.vector_store %arg6[%c0_19, %c0_20], %21 {strides = array<i32>} : memref<8x128xf32, #tpu.memory_space<vmem>>, vector<8x128xf32>,
    } else {
    }
    %c0 = arith.constant 0 : index
    %c0_1 = arith.constant 0 : index
    %3 = vector.load %arg2[%c0, %c0_1] : memref<16x128xf32, #tpu.memory_space<vmem>>, vector<16x128xf32>
    %c0_2 = arith.constant 0 : index
    %c0_3 = arith.constant 0 : index
    %4 = vector.load %arg3[%c0_2, %c0_3] : memref<16x128xf32, #tpu.memory_space<vmem>>, vector<16x128xf32>
    %c0_4 = arith.constant 0 : index
    %c0_5 = arith.constant 0 : index
    %5 = vector.load %arg5[%c0_4, %c0_5] : memref<8x128xf32, #tpu.memory_space<vmem>>, vector<8x128xf32>
    %6 = vector.shape_cast %3 : vector<16x128xf32> to vector<2x8x128xf32>
    %cst = arith.constant dense<0.000000e+00> : vector<8x128xf32>
    %7 = vector.multi_reduction <add>, %6, %cst [0] : vector<2x8x128xf32> to vector<8x128xf32>
    %8 = arith.addf %5, %7 : vector<8x128xf32>
    %c0_6 = arith.constant 0 : index
    %c0_7 = arith.constant 0 : index
    %9 = vector.load %arg5[%c0_6, %c0_7] : memref<8x128xf32, #tpu.memory_space<vmem>>, vector<8x128xf32>
    tpu.vector_store %arg5[%c0_6, %c0_7], %8 {strides = array<i32>} : memref<8x128xf32, #tpu.memory_space<vmem>>, vector<8x128xf32>,
    %c0_8 = arith.constant 0 : index
    %c0_9 = arith.constant 0 : index
    %10 = vector.load %arg6[%c0_8, %c0_9] : memref<8x128xf32, #tpu.memory_space<vmem>>, vector<8x128xf32>
    %11 = arith.mulf %4, %3 : vector<16x128xf32>
    %12 = vector.shape_cast %11 : vector<16x128xf32> to vector<2x8x128xf32>
    %cst_10 = arith.constant dense<0.000000e+00> : vector<8x128xf32>
    %13 = vector.multi_reduction <add>, %12, %cst_10 [0] : vector<2x8x128xf32> to vector<8x128xf32>
    %14 = arith.addf %10, %13 : vector<8x128xf32>
    %c0_11 = arith.constant 0 : index
    %c0_12 = arith.constant 0 : index
    %15 = vector.load %arg6[%c0_11, %c0_12] : memref<8x128xf32, #tpu.memory_space<vmem>>, vector<8x128xf32>
    tpu.vector_store %arg6[%c0_11, %c0_12], %14 {strides = array<i32>} : memref<8x128xf32, #tpu.memory_space<vmem>>, vector<8x128xf32>,
    %c0_i32_13 = arith.constant 0 : i32
    %16 = arith.cmpi eq, %arg1, %c0_i32_13 : i32
    %17 = arith.extui %16 : i1 to i32
    %c0_i32_14 = arith.constant 0 : i32
    %18 = arith.cmpi ne, %17, %c0_i32_14 : i32
    scf.if %18 {
      %c0_15 = arith.constant 0 : index
      %c0_16 = arith.constant 0 : index
      %19 = vector.load %arg5[%c0_15, %c0_16] : memref<8x128xf32, #tpu.memory_space<vmem>>, vector<8x128xf32>
      %20 = vector.shape_cast %19 : vector<8x128xf32> to vector<1x8x128xf32>
      %cst_17 = arith.constant dense<0.000000e+00> : vector<1xf32>
      %21 = vector.multi_reduction <add>, %20, %cst_17 [1, 2] : vector<1x8x128xf32> to vector<1xf32>
      %22 = vector.shape_cast %21 : vector<1xf32> to vector<1x1x1xf32>
      %23 = vector.extract %22[0, 0, 0] : f32 from vector<1x1x1xf32>
      %c0_18 = arith.constant 0 : index
      %c0_19 = arith.constant 0 : index
      %24 = vector.load %arg6[%c0_18, %c0_19] : memref<8x128xf32, #tpu.memory_space<vmem>>, vector<8x128xf32>
      %25 = vector.shape_cast %24 : vector<8x128xf32> to vector<1x8x128xf32>
      %cst_20 = arith.constant dense<0.000000e+00> : vector<1xf32>
      %26 = vector.multi_reduction <add>, %25, %cst_20 [1, 2] : vector<1x8x128xf32> to vector<1xf32>
      %27 = vector.shape_cast %26 : vector<1xf32> to vector<1x1x1xf32>
      %28 = vector.extract %27[0, 0, 0] : f32 from vector<1x1x1xf32>
      %29 = tpu.iota {dimensions = array<i32: 0>} : vector<8x128xi32>
      %c0_i32_21 = arith.constant 0 : i32
      %30 = vector.broadcast %c0_i32_21 : i32 to vector<8x128xi32>
      %31 = arith.cmpi eq, %29, %30 : vector<8x128xi32>
      %32 = vector.broadcast %23 : f32 to vector<8x128xf32>
      %33 = vector.broadcast %28 : f32 to vector<8x128xf32>
      %34 = arith.select %31, %32, %33 : vector<8x128xi1>, vector<8x128xf32>
      %c0_22 = arith.constant 0 : index
      %c0_23 = arith.constant 0 : index
      %c0_24 = arith.constant 0 : index
      %35 = vector.load %arg4[%c0_22, %c0_23, %c0_24] : memref<1x8x128xf32, #tpu.memory_space<vmem>>, vector<1x8x128xf32>
      %36 = vector.shape_cast %35 : vector<1x8x128xf32> to vector<8x128xf32>
      %37 = vector.shape_cast %34 : vector<8x128xf32> to vector<1x8x128xf32>
      tpu.vector_store %arg4[%c0_22, %c0_23, %c0_24], %37 {strides = array<i32>} : memref<1x8x128xf32, #tpu.memory_space<vmem>>, vector<1x8x128xf32>,
    } else {
    }
    return
  }
  func.func @transform_0(%arg0: i32, %arg1: i32) -> (i32, i32) {
    %c1_i32 = arith.constant 1 : i32
    %0 = arith.muli %arg0, %c1_i32 : i32
    %1 = arith.addi %0, %arg1 : i32
    %c0_i32 = arith.constant 0 : i32
    %c0_i32_0 = arith.constant 0 : i32
    return %1, %c0_i32 : i32, i32
  }
  func.func @transform_1(%arg0: i32, %arg1: i32) -> (i32, i32) {
    %c1_i32 = arith.constant 1 : i32
    %0 = arith.muli %arg0, %c1_i32 : i32
    %1 = arith.addi %0, %arg1 : i32
    %c0_i32 = arith.constant 0 : i32
    %c0_i32_0 = arith.constant 0 : i32
    return %1, %c0_i32 : i32, i32
  }
  func.func @transform_2(%arg0: i32, %arg1: i32) -> (i32, i32, i32) {
    %c0_i32 = arith.constant 0 : i32
    %c0_i32_0 = arith.constant 0 : i32
    %c0_i32_1 = arith.constant 0 : i32
    return %arg0, %c0_i32, %c0_i32_0 : i32, i32, i32
  }
}

</mosaic_0001>

<bundles_post_ra>
// kernel: tpu_custom_call.1
= control target key start
LH: loop header
LB: loop body
LE: loop exit
PB: predicated region body
PF: predicated region fallthrough
CT: control target
= control target key end

     0   :  { %7 = vsyncpa [#allocation5], 0  ;;  %s255_s0 = inlined_call_operand.hbm [shape: f32[16,128], index: 0, kind: input, shape index: {}]   ;;  %s256_s1 = inlined_call_operand.hbm [shape: f32[16,128], index: 1, kind: input, shape index: {}]   ;;  %s257_s2 = inlined_call_operand.hbm [shape: f32[1,8,128], index: 2, kind: output, shape index: {}]  }
   0x1   :  { %8 = vsyncpa [#allocation8], 0 }
   0x2   :  { %9 = vsyncpa [#allocation6], 0  ;;  %s199_s9 = smov [#allocation4]   ;;  %s127_s13 = scalar_lea.hbm %s255_s0, 256 }
   0x3   :  { %s19_s10 = sshll.u32 %s199_s9, 4  ;;  %p128_p0 = scmp.ne.s32.totalorder %s255_s0, %s127_s13  ;;  %s20_s10 = int_to_ptr.vmem [resolvable:$true] %s19_s10 }
   0x4   :  { %p131_p1 = scmp.lt.u32.totalorder %s127_s13, %s255_s0 }
   0x6   :  { %p133_p2 = pnand %p131_p1, %p128_p0 }
   0x8   :  { %136 = shalt.err (!%p133_p2)
}
   0x9   :  { %s137_s18 = scalar_lea.vmem %s20_s10, 256  ;;  %p142_p4 = scmp.lt.s32.totalorder %s20_s10, %s20_s10 }
   0xa   :  { %p138_p3 = scmp.ne.s32.totalorder %s20_s10, %s137_s18  ;;  %p143_p5 = scmp.lt.s32.totalorder %s137_s18, %s137_s18 }
   0xc   :  { %p144_p6 = por %p143_p5, %p142_p4 }
   0xe   :  { %p145_p7 = pnand %p144_p6, %p138_p3 }
  0x10   :  { %148 = shalt.err (!%p145_p7)
}
  0x11   :  { %s200_s19 = smov 128   ;;  %s201_s20 = smov 8  }
  0x12   :  { %25 = dma.hbm_to_vmem [thread:$0]  %s255_s0, 256, %s20_s10, [#allocation5], %s200_s19, %s200_s19, %s201_s20  }
  0x13   :  { %s202_s23 = smov [#allocation7]   ;;  %s149_s27 = scalar_lea.hbm %s256_s1, 256 }
  0x14   :  { %s35_s24 = sshll.u32 %s202_s23, 4  ;;  %p150_p8 = scmp.ne.s32.totalorder %s256_s1, %s149_s27  ;;  %s36_s24 = int_to_ptr.vmem [resolvable:$true] %s35_s24 }
  0x15   :  { %p153_p9 = scmp.lt.u32.totalorder %s149_s27, %s256_s1 }
  0x17   :  { %p155_p10 = pnand %p153_p9, %p150_p8 }
  0x19   :  { %158 = shalt.err (!%p155_p10)
}
  0x1a   :  { %s159_s4 = scalar_lea.vmem %s36_s24, 256  ;;  %p164_p12 = scmp.lt.s32.totalorder %s36_s24, %s36_s24 }
  0x1b   :  { %p160_p11 = scmp.ne.s32.totalorder %s36_s24, %s159_s4  ;;  %p165_p13 = scmp.lt.s32.totalorder %s159_s4, %s159_s4 }
  0x1d   :  { %p166_p0 = por %p165_p13, %p164_p12 }
  0x1f   :  { %p167_p1 = pnand %p166_p0, %p160_p11 }
  0x21   :  { %170 = shalt.err (!%p167_p1)
}
  0x22   :  { %41 = dma.hbm_to_vmem [thread:$0]  %s256_s1, 256, %s36_s24, [#allocation8], %s200_s19, %s200_s19, %s201_s20  }
  0x23   :  { %193 = dma.done.wait [#allocation5], 256  }
  0x24   :  { %194 = vsyncadd [#allocation5], 4294967040 }
  0x25   :  { %195 = dma.done.wait [#allocation8], 256  }
  0x26   :  { %196 = vsyncadd [#allocation8], 4294967040  ;;  %v58_v0 = vld [vmem:[#allocation4] sm:$0xff]  ;;  %v59_v1 = vld [vmem:[#allocation4 + $0x8] sm:$0xff]  ;;  %v95_v22 = vlaneseq  ;;  %s203_s6 = smov [#allocation9]  }
  0x27   :  { %v60_v2 = vld [vmem:[#allocation7] sm:$0xff]  ;;  %v61_v3 = vld [vmem:[#allocation7 + $0x8] sm:$0xff]  ;;  %v63_v4 = vadd.f32 %v59_v1, %v58_v0  ;;  %s108_s7 = sshll.u32 %s203_s6, 4  ;;  %s109_s7 = int_to_ptr.vmem [resolvable:$true] %s108_s7 }
  0x28   :  { %v67_v5 = vmul.f32 %v60_v2, %v58_v0  ;;  %v68_v6 = vmul.f32 %v61_v3, %v59_v1  ;;  %v96_v23 = vshrl.u32 %v95_v22, 7  ;;  %s171_s9 = scalar_lea.vmem %s109_s7, 128  ;;  %p176_p3 = scmp.lt.s32.totalorder %s109_s7, %s109_s7 }
  0x29   :  { %76 = vadd.xlane.f32.xlu0 %v63_v4  ;;  %p172_p2 = scmp.ne.s32.totalorder %s109_s7, %s171_s9  ;;  %p177_p4 = scmp.lt.s32.totalorder %s171_s9, %s171_s9 }
  0x2a   :  { %v69_v7 = vadd.f32 %v68_v6, %v67_v5  ;;  %vm97_vm0 = vcmp.eq.s32.totalorder %v96_v23, 0 }
  0x2b   :  { %p178_p5 = por %p177_p4, %p176_p3 }
  0x2d   :  { %86 = vadd.xlane.f32.xlu0 %v69_v7  ;;  %p179_p6 = pnand %p178_p5, %p172_p2 }
  0xb6   :  { %v77_v8 = vpop.xlane.xlu0 %76 }
  0xb7   :  { %v78_v9 = vrot.slane %v77_v8, 4 }
  0xb9   :  { %v79_v10 = vadd.f32 %v78_v9, %v77_v8 }
  0xba   :  { %v87_v11 = vpop.xlane.xlu0 %86 }
  0xbb   :  { %v80_v12 = vrot.slane %v79_v10, 2  ;;  %v88_v13 = vrot.slane %v87_v11, 4 }
  0xbd   :  { %v89_v14 = vadd.f32 %v88_v13, %v87_v11  ;;  %v81_v15 = vadd.f32 %v80_v12, %v79_v10 }
  0xbf   :  { %v90_v16 = vrot.slane %v89_v14, 2  ;;  %v82_v17 = vrot.slane %v81_v15, 1 }
  0xc1   :  { %v91_v18 = vadd.f32 %v90_v16, %v89_v14  ;;  %v83_v19 = vadd.f32 %v82_v17, %v81_v15 }
  0xc3   :  { %118 = vpush %v83_v19  ;;  %v92_v20 = vrot.slane %v91_v18, 1 }
  0xc5   :  { %v93_v21 = vadd.f32 %v92_v20, %v91_v18 }
  0xc7   :  { %120 = vpush %v93_v21 }
  0xf4   :  { %s119_s1 = spop %118 }
  0xf5   :  { %v98_v24 = vstv %s119_s1 }
  0xf8   :  { %s121_s8 = spop %120 }
  0xf9   :  { %v99_v25 = vstv %s121_s8 }
  0xfa   :  { %v100_v26 = vsel %vm97_vm0, %v98_v24, %v99_v25 }
  0xfb   :  { %101 = vst [vmem:[#allocation9] sm:$0xff] %v100_v26 }
  0xfc   :  { %182 = shalt.err (!%p179_p6)
}
  0xfd   :  { %s183_s12 = scalar_lea.hbm %s257_s2, 128 }
  0xfe   :  { %p184_p7 = scmp.ne.s32.totalorder %s257_s2, %s183_s12  ;;  %p187_p8 = scmp.lt.u32.totalorder %s183_s12, %s257_s2 }
 0x100   :  { %p189_p9 = pnand %p187_p8, %p184_p7 }
 0x102   :  { %192 = shalt.err (!%p189_p9)
}
 0x103   :  { %111 = dma.vmem_to_hbm [thread:$0]  %s109_s7, 128, %s257_s2, [#allocation6]  }
 0x104   :  { %197 = dma.done.wait [#allocation6], 128  }
 0x105   :  { %198 = vsyncadd [#allocation6], 4294967168 }
 0x106   :  { %115 = vsyncpa [#allocation5], 1 }
 0x107   :  { %116 = vsyncpa [#allocation8], 1 }
 0x108   :  { %117 = vsyncpa [#allocation6], 1 }

</bundles_post_ra>
